<compile_context>
chip_gen: v7x
topology: tpu7x:2x2x1
jax: 0.10.0
libtpu: 0.0.40
codegen_flags: <defaults>
</compile_context>

<pallas_src>
import functools

import jax
import jax.numpy as jnp
from jax.experimental import pallas as pl
from jax.experimental.pallas import tpu as pltpu

LAYER_DIM = 64
PAD = 128  # lane width: pad every feature axis to this


def _dueling_kernel(x_ref,
                    w1_ref, b1_ref, w2_ref, b2_ref,
                    wa1_ref, ba1_ref, wa2_ref, ba2_ref,
                    wv1_ref, bv1_ref, wv2_ref, bv2_ref,
                    o_ref, *, inv_n_actions):
    x = x_ref[...]

    # Shared feature trunk (all matmuls are [tile_b,128] @ [128,128] on the MXU).
    h = jnp.maximum(
        jnp.dot(x, w1_ref[...], preferred_element_type=jnp.float32) + b1_ref[...], 0.0)
    feat = jnp.maximum(
        jnp.dot(h, w2_ref[...], preferred_element_type=jnp.float32) + b2_ref[...], 0.0)

    # Advantage stream. Padded action columns have zero weights/bias -> adv[:, A:] == 0.
    ah = jnp.maximum(
        jnp.dot(feat, wa1_ref[...], preferred_element_type=jnp.float32) + ba1_ref[...], 0.0)
    adv = jnp.dot(ah, wa2_ref[...], preferred_element_type=jnp.float32) + ba2_ref[...]

    # Value stream. wv2/bv2 are replicated across all 128 lanes, so `val` already
    # holds V(s) broadcast over the lane axis (no 1-lane slice / relayout needed).
    vh = jnp.maximum(
        jnp.dot(feat, wv1_ref[...], preferred_element_type=jnp.float32) + bv1_ref[...], 0.0)
    val = jnp.dot(vh, wv2_ref[...], preferred_element_type=jnp.float32) + bv2_ref[...]

    # mean over the true n_actions: padded lanes are exactly zero, so a full-lane
    # sum equals the sum over valid actions.
    adv_mean = jnp.sum(adv, axis=-1, keepdims=True) * inv_n_actions

    o_ref[...] = val + adv - adv_mean


def _pad2(a, rows, cols):
    return jnp.pad(a, ((0, rows - a.shape[0]), (0, cols - a.shape[1])))


def pad_params(p):
    """Zero-pad all weights/biases to 128-lane-dense shapes (done once, outside the kernel)."""
    pp = {
        "w1": _pad2(p["w1"], PAD, PAD),  "b1": _pad2(p["b1"], 1, PAD),
        "w2": _pad2(p["w2"], PAD, PAD),  "b2": _pad2(p["b2"], 1, PAD),
        "wa1": _pad2(p["wa1"], PAD, PAD), "ba1": _pad2(p["ba1"], 1, PAD),
        "wa2": _pad2(p["wa2"], PAD, PAD), "ba2": _pad2(p["ba2"], 1, PAD),
        "wv1": _pad2(p["wv1"], PAD, PAD), "bv1": _pad2(p["bv1"], 1, PAD),
    }
    # Value head: replicate the single output column across all 128 lanes so the
    # kernel's matmul directly produces V broadcast on the lane axis.
    wv2_col = _pad2(p["wv2"], PAD, 1)                 # [128, 1]
    pp["wv2"] = jnp.tile(wv2_col, (1, PAD))           # [128, 128]
    pp["bv2"] = jnp.tile(p["bv2"], (1, PAD))          # [1, 128]
    return pp


def dueling_qnetwork_forward(x, padded_params, n_actions, *, tile_b=None):
    """x: [B, state_dim] float32. padded_params: output of pad_params()."""
    B, state_dim = x.shape
    assert state_dim <= PAD

    if tile_b is None:
        # Multiple of 8 rows (f32 sublane); cap at 512 so double-buffered x/o tiles
        # plus resident weights stay well inside even v7x's 64 MiB VMEM.
        tile_b = min(512, ((B + 7) // 8) * 8)
    assert tile_b % 8 == 0

    n_tiles = pl.cdiv(B, tile_b)
    b_pad = n_tiles * tile_b

    # Pad batch to a tile multiple and features to 128 lanes.
    x_pad = jnp.pad(x, ((0, b_pad - B), (0, PAD - state_dim)))

    p = padded_params
    weight_spec = pl.BlockSpec((PAD, PAD), lambda i: (0, 0))
    bias_spec = pl.BlockSpec((1, PAD), lambda i: (0, 0))

    flops = 2 * b_pad * PAD * PAD * 6  # six [tile_b,128]x[128,128] matmuls per row
    bytes_accessed = (x_pad.size + b_pad * PAD) * 4 + sum(v.size for v in p.values()) * 4

    kernel = functools.partial(_dueling_kernel, inv_n_actions=1.0 / float(n_actions))

    out = pl.pallas_call(
        kernel,
        out_shape=jax.ShapeDtypeStruct((b_pad, PAD), jnp.float32),
        grid_spec=pltpu.PrefetchScalarGridSpec(
            num_scalar_prefetch=0,
            grid=(n_tiles,),
            in_specs=[
                pl.BlockSpec((tile_b, PAD), lambda i: (i, 0)),   # x tile
                weight_spec, bias_spec,                          # w1, b1
                weight_spec, bias_spec,                          # w2, b2
                weight_spec, bias_spec,                          # wa1, ba1
                weight_spec, bias_spec,                          # wa2, ba2
                weight_spec, bias_spec,                          # wv1, bv1
                weight_spec, bias_spec,                          # wv2, bv2
            ],
            out_specs=pl.BlockSpec((tile_b, PAD), lambda i: (i, 0)),
        ),
        compiler_params=pltpu.CompilerParams(
            dimension_semantics=("parallel",)),
        cost_estimate=pl.CostEstimate(
            flops=flops, transcendentals=0, bytes_accessed=bytes_accessed),
    )(x_pad,
      p["w1"], p["b1"], p["w2"], p["b2"],
      p["wa1"], p["ba1"], p["wa2"], p["ba2"],
      p["wv1"], p["bv1"], p["wv2"], p["bv2"])

    return out[:B, :n_actions]


def init_params(key, state_dim, n_actions):
    # Deterministic synthetic init matching nn.Linear shapes (uniform +/- 1/sqrt(fan_in)).
    # TODO(synk): does not replicate torch.manual_seed()'s exact RNG stream, only the shapes/ranges.
    ks = jax.random.split(key, 12)

    def linear(kw, kb, fan_in, fan_out):
        bound = 1.0 / jnp.sqrt(jnp.float32(fan_in))
        w = jax.random.uniform(kw, (fan_in, fan_out), jnp.float32, -bound, bound)
        b = jax.random.uniform(kb, (1, fan_out), jnp.float32, -bound, bound)
        return w, b

    w1, b1 = linear(ks[0], ks[1], state_dim, LAYER_DIM)
    w2, b2 = linear(ks[2], ks[3], LAYER_DIM, LAYER_DIM)
    wa1, ba1 = linear(ks[4], ks[5], LAYER_DIM, LAYER_DIM)
    wa2, ba2 = linear(ks[6], ks[7], LAYER_DIM, n_actions)
    wv1, bv1 = linear(ks[8], ks[9], LAYER_DIM, LAYER_DIM)
    wv2, bv2 = linear(ks[10], ks[11], LAYER_DIM, 1)
    return {"w1": w1, "b1": b1, "w2": w2, "b2": b2,
            "wa1": wa1, "ba1": ba1, "wa2": wa2, "ba2": ba2,
            "wv1": wv1, "bv1": bv1, "wv2": wv2, "bv2": bv2}


def reference_forward(x, p):
    feat = jnp.maximum(x @ p["w1"] + p["b1"], 0.0)
    feat = jnp.maximum(feat @ p["w2"] + p["b2"], 0.0)
    ah = jnp.maximum(feat @ p["wa1"] + p["ba1"], 0.0)
    adv = ah @ p["wa2"] + p["ba2"]
    vh = jnp.maximum(feat @ p["wv1"] + p["bv1"], 0.0)
    val = vh @ p["wv2"] + p["bv2"]
    return val + adv - jnp.mean(adv, axis=-1, keepdims=True)


if __name__ == "__main__":
    key = jax.random.PRNGKey(0)
    k_x, k_p = jax.random.split(key)

    batch, state_dim, n_actions = 8, 16, 4
    x = jax.random.normal(k_x, (batch, state_dim), jnp.float32)
    params = init_params(k_p, state_dim, n_actions)
    padded = pad_params(params)

    out = dueling_qnetwork_forward(x, padded, n_actions)
    out = jax.block_until_ready(out)

    ref = reference_forward(x, params)
    assert out.shape == (batch, n_actions)
    assert jnp.allclose(out, ref, atol=1e-5, rtol=1e-5), \
        f"max abs err = {jnp.max(jnp.abs(out - ref))}"

    print("KERNEL_OK")
</pallas_src>

<mosaic_0001>
module attributes {stable_mosaic.version = 11 : i64} {
  func.func @_dueling_kernel(%arg0: i32, %arg1: memref<8x128xf32, #tpu.memory_space<vmem>>, %arg2: memref<128x128xf32, #tpu.memory_space<vmem>>, %arg3: memref<1x128xf32, #tpu.memory_space<vmem>>, %arg4: memref<128x128xf32, #tpu.memory_space<vmem>>, %arg5: memref<1x128xf32, #tpu.memory_space<vmem>>, %arg6: memref<128x128xf32, #tpu.memory_space<vmem>>, %arg7: memref<1x128xf32, #tpu.memory_space<vmem>>, %arg8: memref<128x128xf32, #tpu.memory_space<vmem>>, %arg9: memref<1x128xf32, #tpu.memory_space<vmem>>, %arg10: memref<128x128xf32, #tpu.memory_space<vmem>>, %arg11: memref<1x128xf32, #tpu.memory_space<vmem>>, %arg12: memref<128x128xf32, #tpu.memory_space<vmem>>, %arg13: memref<1x128xf32, #tpu.memory_space<vmem>>, %arg14: memref<8x128xf32, #tpu.memory_space<vmem>>) attributes {dimension_semantics = [#tpu.dimension_semantics<parallel>], iteration_bounds = array<i64: 1>, scalar_prefetch = 0 : i64, scratch_operands = 0 : i64, tpu.core_type = #tpu.core_type<tc>, window_params = [{transform_indices = @transform_0, window_bounds = array<i64: 8, 128>}, {pipeline_mode = #tpu.pipeline_mode<synchronous>, transform_indices = @transform_1, window_bounds = array<i64: 128, 128>}, {pipeline_mode = #tpu.pipeline_mode<synchronous>, transform_indices = @transform_2, window_bounds = array<i64: 1, 128>}, {pipeline_mode = #tpu.pipeline_mode<synchronous>, transform_indices = @transform_3, window_bounds = array<i64: 128, 128>}, {pipeline_mode = #tpu.pipeline_mode<synchronous>, transform_indices = @transform_4, window_bounds = array<i64: 1, 128>}, {pipeline_mode = #tpu.pipeline_mode<synchronous>, transform_indices = @transform_5, window_bounds = array<i64: 128, 128>}, {pipeline_mode = #tpu.pipeline_mode<synchronous>, transform_indices = @transform_6, window_bounds = array<i64: 1, 128>}, {pipeline_mode = #tpu.pipeline_mode<synchronous>, transform_indices = @transform_7, window_bounds = array<i64: 128, 128>}, {pipeline_mode = #tpu.pipeline_mode<synchronous>, transform_indices = @transform_8, window_bounds = array<i64: 1, 128>}, {pipeline_mode = #tpu.pipeline_mode<synchronous>, transform_indices = @transform_9, window_bounds = array<i64: 128, 128>}, {pipeline_mode = #tpu.pipeline_mode<synchronous>, transform_indices = @transform_10, window_bounds = array<i64: 1, 128>}, {pipeline_mode = #tpu.pipeline_mode<synchronous>, transform_indices = @transform_11, window_bounds = array<i64: 128, 128>}, {pipeline_mode = #tpu.pipeline_mode<synchronous>, transform_indices = @transform_12, window_bounds = array<i64: 1, 128>}, {transform_indices = @transform_13, window_bounds = array<i64: 8, 128>}]} {
    %c0 = arith.constant 0 : index
    %c0_0 = arith.constant 0 : index
    %0 = vector.load %arg1[%c0, %c0_0] : memref<8x128xf32, #tpu.memory_space<vmem>>, vector<8x128xf32>
    %c0_1 = arith.constant 0 : index
    %c0_2 = arith.constant 0 : index
    %1 = vector.load %arg2[%c0_1, %c0_2] : memref<128x128xf32, #tpu.memory_space<vmem>>, vector<128x128xf32>
    %cst = arith.constant dense<0.000000e+00> : vector<8x128xf32>
    %2 = tpu.matmul %0, %1, %cst {dimension_numbers = #tpu.dot_dimension_numbers<[1], [0], [0], [1], [0, 0, 1, 1], [], []>} : vector<8x128xf32>, vector<128x128xf32>, vector<8x128xf32> -> vector<8x128xf32>
    %c0_3 = arith.constant 0 : index
    %c0_4 = arith.constant 0 : index
    %3 = vector.load %arg3[%c0_3, %c0_4] : memref<1x128xf32, #tpu.memory_space<vmem>>, vector<1x128xf32>
    %4 = vector.broadcast %3 : vector<1x128xf32> to vector<8x128xf32>
    %5 = arith.addf %2, %4 : vector<8x128xf32>
    %cst_5 = arith.constant 0.000000e+00 : f32
    %6 = vector.broadcast %cst_5 : f32 to vector<8x128xf32>
    %7 = arith.maximumf %5, %6 : vector<8x128xf32>
    %c0_6 = arith.constant 0 : index
    %c0_7 = arith.constant 0 : index
    %8 = vector.load %arg4[%c0_6, %c0_7] : memref<128x128xf32, #tpu.memory_space<vmem>>, vector<128x128xf32>
    %cst_8 = arith.constant dense<0.000000e+00> : vector<8x128xf32>
    %9 = tpu.matmul %7, %8, %cst_8 {dimension_numbers = #tpu.dot_dimension_numbers<[1], [0], [0], [1], [0, 0, 1, 1], [], []>} : vector<8x128xf32>, vector<128x128xf32>, vector<8x128xf32> -> vector<8x128xf32>
    %c0_9 = arith.constant 0 : index
    %c0_10 = arith.constant 0 : index
    %10 = vector.load %arg5[%c0_9, %c0_10] : memref<1x128xf32, #tpu.memory_space<vmem>>, vector<1x128xf32>
    %11 = vector.broadcast %10 : vector<1x128xf32> to vector<8x128xf32>
    %12 = arith.addf %9, %11 : vector<8x128xf32>
    %cst_11 = arith.constant 0.000000e+00 : f32
    %13 = vector.broadcast %cst_11 : f32 to vector<8x128xf32>
    %14 = arith.maximumf %12, %13 : vector<8x128xf32>
    %c0_12 = arith.constant 0 : index
    %c0_13 = arith.constant 0 : index
    %15 = vector.load %arg6[%c0_12, %c0_13] : memref<128x128xf32, #tpu.memory_space<vmem>>, vector<128x128xf32>
    %cst_14 = arith.constant dense<0.000000e+00> : vector<8x128xf32>
    %16 = tpu.matmul %14, %15, %cst_14 {dimension_numbers = #tpu.dot_dimension_numbers<[1], [0], [0], [1], [0, 0, 1, 1], [], []>} : vector<8x128xf32>, vector<128x128xf32>, vector<8x128xf32> -> vector<8x128xf32>
    %c0_15 = arith.constant 0 : index
    %c0_16 = arith.constant 0 : index
    %17 = vector.load %arg7[%c0_15, %c0_16] : memref<1x128xf32, #tpu.memory_space<vmem>>, vector<1x128xf32>
    %18 = vector.broadcast %17 : vector<1x128xf32> to vector<8x128xf32>
    %19 = arith.addf %16, %18 : vector<8x128xf32>
    %cst_17 = arith.constant 0.000000e+00 : f32
    %20 = vector.broadcast %cst_17 : f32 to vector<8x128xf32>
    %21 = arith.maximumf %19, %20 : vector<8x128xf32>
    %c0_18 = arith.constant 0 : index
    %c0_19 = arith.constant 0 : index
    %22 = vector.load %arg8[%c0_18, %c0_19] : memref<128x128xf32, #tpu.memory_space<vmem>>, vector<128x128xf32>
    %cst_20 = arith.constant dense<0.000000e+00> : vector<8x128xf32>
    %23 = tpu.matmul %21, %22, %cst_20 {dimension_numbers = #tpu.dot_dimension_numbers<[1], [0], [0], [1], [0, 0, 1, 1], [], []>} : vector<8x128xf32>, vector<128x128xf32>, vector<8x128xf32> -> vector<8x128xf32>
    %c0_21 = arith.constant 0 : index
    %c0_22 = arith.constant 0 : index
    %24 = vector.load %arg9[%c0_21, %c0_22] : memref<1x128xf32, #tpu.memory_space<vmem>>, vector<1x128xf32>
    %25 = vector.broadcast %24 : vector<1x128xf32> to vector<8x128xf32>
    %26 = arith.addf %23, %25 : vector<8x128xf32>
    %c0_23 = arith.constant 0 : index
    %c0_24 = arith.constant 0 : index
    %27 = vector.load %arg10[%c0_23, %c0_24] : memref<128x128xf32, #tpu.memory_space<vmem>>, vector<128x128xf32>
    %cst_25 = arith.constant dense<0.000000e+00> : vector<8x128xf32>
    %28 = tpu.matmul %14, %27, %cst_25 {dimension_numbers = #tpu.dot_dimension_numbers<[1], [0], [0], [1], [0, 0, 1, 1], [], []>} : vector<8x128xf32>, vector<128x128xf32>, vector<8x128xf32> -> vector<8x128xf32>
    %c0_26 = arith.constant 0 : index
    %c0_27 = arith.constant 0 : index
    %29 = vector.load %arg11[%c0_26, %c0_27] : memref<1x128xf32, #tpu.memory_space<vmem>>, vector<1x128xf32>
    %30 = vector.broadcast %29 : vector<1x128xf32> to vector<8x128xf32>
    %31 = arith.addf %28, %30 : vector<8x128xf32>
    %cst_28 = arith.constant 0.000000e+00 : f32
    %32 = vector.broadcast %cst_28 : f32 to vector<8x128xf32>
    %33 = arith.maximumf %31, %32 : vector<8x128xf32>
    %c0_29 = arith.constant 0 : index
    %c0_30 = arith.constant 0 : index
    %34 = vector.load %arg12[%c0_29, %c0_30] : memref<128x128xf32, #tpu.memory_space<vmem>>, vector<128x128xf32>
    %cst_31 = arith.constant dense<0.000000e+00> : vector<8x128xf32>
    %35 = tpu.matmul %33, %34, %cst_31 {dimension_numbers = #tpu.dot_dimension_numbers<[1], [0], [0], [1], [0, 0, 1, 1], [], []>} : vector<8x128xf32>, vector<128x128xf32>, vector<8x128xf32> -> vector<8x128xf32>
    %c0_32 = arith.constant 0 : index
    %c0_33 = arith.constant 0 : index
    %36 = vector.load %arg13[%c0_32, %c0_33] : memref<1x128xf32, #tpu.memory_space<vmem>>, vector<1x128xf32>
    %37 = vector.broadcast %36 : vector<1x128xf32> to vector<8x128xf32>
    %38 = arith.addf %35, %37 : vector<8x128xf32>
    %cst_34 = arith.constant dense<0.000000e+00> : vector<8xf32>
    %39 = vector.multi_reduction <add>, %26, %cst_34 [1] : vector<8x128xf32> to vector<8xf32>
    %40 = vector.shape_cast %39 : vector<8xf32> to vector<8x1xf32>
    %cst_35 = arith.constant 2.500000e-01 : f32
    %41 = vector.broadcast %cst_35 : f32 to vector<8x1xf32>
    %42 = arith.mulf %40, %41 : vector<8x1xf32>
    %43 = arith.addf %38, %26 : vector<8x128xf32>
    %44 = vector.broadcast %42 : vector<8x1xf32> to vector<8x128xf32>
    %45 = arith.subf %43, %44 : vector<8x128xf32>
    %c0_36 = arith.constant 0 : index
    %c0_37 = arith.constant 0 : index
    %46 = vector.load %arg14[%c0_36, %c0_37] : memref<8x128xf32, #tpu.memory_space<vmem>>, vector<8x128xf32>
    tpu.vector_store %arg14[%c0_36, %c0_37], %45 {strides = array<i32>} : memref<8x128xf32, #tpu.memory_space<vmem>>, vector<8x128xf32>,
    return
  }
  func.func @transform_0(%arg0: i32) -> (i32, i32) {
    %c0_i32 = arith.constant 0 : i32
    %c0_i32_0 = arith.constant 0 : i32
    return %arg0, %c0_i32 : i32, i32
  }
  func.func @transform_1(%arg0: i32) -> (i32, i32) {
    %c0_i32 = arith.constant 0 : i32
    %c0_i32_0 = arith.constant 0 : i32
    %c0_i32_1 = arith.constant 0 : i32
    return %c0_i32, %c0_i32_0 : i32, i32
  }
  func.func @transform_2(%arg0: i32) -> (i32, i32) {
    %c0_i32 = arith.constant 0 : i32
    %c0_i32_0 = arith.constant 0 : i32
    %c0_i32_1 = arith.constant 0 : i32
    return %c0_i32, %c0_i32_0 : i32, i32
  }
  func.func @transform_3(%arg0: i32) -> (i32, i32) {
    %c0_i32 = arith.constant 0 : i32
    %c0_i32_0 = arith.constant 0 : i32
    %c0_i32_1 = arith.constant 0 : i32
    return %c0_i32, %c0_i32_0 : i32, i32
  }
  func.func @transform_4(%arg0: i32) -> (i32, i32) {
    %c0_i32 = arith.constant 0 : i32
    %c0_i32_0 = arith.constant 0 : i32
    %c0_i32_1 = arith.constant 0 : i32
    return %c0_i32, %c0_i32_0 : i32, i32
  }
  func.func @transform_5(%arg0: i32) -> (i32, i32) {
    %c0_i32 = arith.constant 0 : i32
    %c0_i32_0 = arith.constant 0 : i32
    %c0_i32_1 = arith.constant 0 : i32
    return %c0_i32, %c0_i32_0 : i32, i32
  }
  func.func @transform_6(%arg0: i32) -> (i32, i32) {
    %c0_i32 = arith.constant 0 : i32
    %c0_i32_0 = arith.constant 0 : i32
    %c0_i32_1 = arith.constant 0 : i32
    return %c0_i32, %c0_i32_0 : i32, i32
  }
  func.func @transform_7(%arg0: i32) -> (i32, i32) {
    %c0_i32 = arith.constant 0 : i32
    %c0_i32_0 = arith.constant 0 : i32
    %c0_i32_1 = arith.constant 0 : i32
    return %c0_i32, %c0_i32_0 : i32, i32
  }
  func.func @transform_8(%arg0: i32) -> (i32, i32) {
    %c0_i32 = arith.constant 0 : i32
    %c0_i32_0 = arith.constant 0 : i32
    %c0_i32_1 = arith.constant 0 : i32
    return %c0_i32, %c0_i32_0 : i32, i32
  }
  func.func @transform_9(%arg0: i32) -> (i32, i32) {
    %c0_i32 = arith.constant 0 : i32
    %c0_i32_0 = arith.constant 0 : i32
    %c0_i32_1 = arith.constant 0 : i32
    return %c0_i32, %c0_i32_0 : i32, i32
  }
  func.func @transform_10(%arg0: i32) -> (i32, i32) {
    %c0_i32 = arith.constant 0 : i32
    %c0_i32_0 = arith.constant 0 : i32
    %c0_i32_1 = arith.constant 0 : i32
    return %c0_i32, %c0_i32_0 : i32, i32
  }
  func.func @transform_11(%arg0: i32) -> (i32, i32) {
    %c0_i32 = arith.constant 0 : i32
    %c0_i32_0 = arith.constant 0 : i32
    %c0_i32_1 = arith.constant 0 : i32
    return %c0_i32, %c0_i32_0 : i32, i32
  }
  func.func @transform_12(%arg0: i32) -> (i32, i32) {
    %c0_i32 = arith.constant 0 : i32
    %c0_i32_0 = arith.constant 0 : i32
    %c0_i32_1 = arith.constant 0 : i32
    return %c0_i32, %c0_i32_0 : i32, i32
  }
  func.func @transform_13(%arg0: i32) -> (i32, i32) {
    %c0_i32 = arith.constant 0 : i32
    %c0_i32_0 = arith.constant 0 : i32
    return %arg0, %c0_i32 : i32, i32
  }
}

</mosaic_0001>

<bundles_post_ra>
// kernel: tpu_custom_call.1
= control target key start
LH: loop header
LB: loop body
LE: loop exit
PB: predicated region body
PF: predicated region fallthrough
CT: control target
= control target key end

     0   :  { %18 = vsyncpa [#allocation3], 0  ;;  %s1661_s0 = inlined_call_operand.hbm [shape: f32[8,128], index: 0, kind: input, shape index: {}]   ;;  %s1662_s1 = inlined_call_operand.hbm [shape: f32[128,128], index: 1, kind: input, shape index: {}]   ;;  %s1663_s2 = inlined_call_operand.vmem [shape: f32[1,128], index: 2, kind: input, shape index: {}]   ;;  %s1664_s3 = inlined_call_operand.hbm [shape: f32[128,128], index: 3, kind: input, shape index: {}]   ;;  %s1665_s4 = inlined_call_operand.vmem [shape: f32[1,128], index: 4, kind: input, shape index: {}]   ;;  %s1666_s5 = inlined_call_operand.hbm [shape: f32[128,128], index: 5, kind: input, shape index: {}]   ;;  %s1667_s6 = inlined_call_operand.vmem [shape: f32[1,128], index: 6, kind: input, shape index: {}]   ;;  %s1668_s7 = inlined_call_operand.hbm [shape: f32[128,128], index: 7, kind: input, shape index: {}]   ;;  %s1669_s8 = inlined_call_operand.vmem [shape: f32[1,128], index: 8, kind: input, shape index: {}]   ;;  %s1670_s9 = inlined_call_operand.hbm [shape: f32[128,128], index: 9, kind: input, shape index: {}]   ;;  %s1671_s10 = inlined_call_operand.vmem [shape: f32[1,128], index: 10, kind: input, shape index: {}]   ;;  %s1672_s11 = inlined_call_operand.hbm [shape: f32[128,128], index: 11, kind: input, shape index: {}]   ;;  %s1673_s12 = inlined_call_operand.vmem [shape: f32[1,128], index: 12, kind: input, shape index: {}]   ;;  %s1674_s13 = inlined_call_operand.hbm [shape: f32[8,128], index: 13, kind: output, shape index: {}]  }
   0x1   :  { %19 = vsyncpa [#allocation6], 0 }
   0x2   :  { %20 = vsyncpa [#allocation9], 0 }
   0x3   :  { %21 = vsyncpa [#allocation12], 0 }
   0x4   :  { %22 = vsyncpa [#allocation4], 0  ;;  %s1386_s25 = smov [#allocation5]   ;;  %s1200_s29 = scalar_lea.hbm %s1662_s1, 2048 }
   0x5   :  { %s38_s26 = sshll.u32 %s1386_s25, 4  ;;  %p1201_p0 = scmp.ne.s32.totalorder %s1662_s1, %s1200_s29  ;;  %s39_s26 = int_to_ptr.vmem [resolvable:$true] %s38_s26 }
   0x6   :  { %p1204_p1 = scmp.lt.u32.totalorder %s1200_s29, %s1662_s1 }
   0x8   :  { %p1206_p2 = pnand %p1204_p1, %p1201_p0 }
   0xa   :  { %1209 = shalt.err (!%p1206_p2)
}
   0xb   :  { %s1210_s17 = scalar_lea.vmem %s39_s26, 2048  ;;  %p1215_p4 = scmp.lt.s32.totalorder %s39_s26, %s39_s26 }
   0xc   :  { %p1211_p3 = scmp.ne.s32.totalorder %s39_s26, %s1210_s17  ;;  %p1216_p5 = scmp.lt.s32.totalorder %s1210_s17, %s1210_s17 }
   0xe   :  { %p1217_p6 = por %p1216_p5, %p1215_p4 }
  0x10   :  { %p1218_p7 = pnand %p1217_p6, %p1211_p3 }
  0x12   :  { %1221 = shalt.err (!%p1218_p7)
}
  0x13   :  { %s1387_s18 = smov 128   ;;  %s1388_s19 = smov 8  }
  0x14   :  { %44 = dma.hbm_to_vmem [thread:$0]  %s1662_s1, 2048, %s39_s26, [#allocation6], %s1387_s18, %s1387_s18, %s1388_s19  }
  0x15   :  { %s1389_s22 = smov [#allocation8]   ;;  %s1390_s24 = smov [#allocation11]  }
  0x16   :  { %s66_s23 = sshll.u32 %s1389_s22, 4  ;;  %s94_s25 = sshll.u32 %s1390_s24, 4  ;;  %s67_s23 = int_to_ptr.vmem [resolvable:$true] %s66_s23  ;;  %s95_s25 = int_to_ptr.vmem [resolvable:$true] %s94_s25 }
  0x17   :  { %s1222_s29 = scalar_lea.hbm %s1666_s5, 2048 }
  0x18   :  { %p1223_p8 = scmp.ne.s32.totalorder %s1666_s5, %s1222_s29  ;;  %p1226_p9 = scmp.lt.u32.totalorder %s1222_s29, %s1666_s5 }
  0x1a   :  { %p1228_p10 = pnand %p1226_p9, %p1223_p8 }
  0x1c   :  { %1231 = shalt.err (!%p1228_p10)
}
  0x1d   :  { %s1232_s1 = scalar_lea.vmem %s67_s23, 2048  ;;  %p1237_p12 = scmp.lt.s32.totalorder %s67_s23, %s67_s23 }
  0x1e   :  { %p1233_p11 = scmp.ne.s32.totalorder %s67_s23, %s1232_s1  ;;  %p1238_p13 = scmp.lt.s32.totalorder %s1232_s1, %s1232_s1 }
  0x20   :  { %p1239_p0 = por %p1238_p13, %p1237_p12 }
  0x22   :  { %p1240_p1 = pnand %p1239_p0, %p1233_p11 }
  0x24   :  { %1243 = shalt.err (!%p1240_p1)
}
  0x25   :  { %72 = dma.hbm_to_vmem [thread:$0]  %s1666_s5, 2048, %s67_s23, [#allocation9], %s1387_s18, %s1387_s18, %s1388_s19  }
  0x26   :  { %s1244_s22 = scalar_lea.hbm %s1670_s9, 2048 }
  0x27   :  { %p1245_p2 = scmp.ne.s32.totalorder %s1670_s9, %s1244_s22  ;;  %p1248_p3 = scmp.lt.u32.totalorder %s1244_s22, %s1670_s9 }
  0x29   :  { %p1250_p4 = pnand %p1248_p3, %p1245_p2 }
  0x2b   :  { %1253 = shalt.err (!%p1250_p4)
}
  0x2c   :  { %s1254_s30 = scalar_lea.vmem %s95_s25, 2048  ;;  %p1259_p6 = scmp.lt.s32.totalorder %s95_s25, %s95_s25 }
  0x2d   :  { %p1255_p5 = scmp.ne.s32.totalorder %s95_s25, %s1254_s30  ;;  %p1260_p7 = scmp.lt.s32.totalorder %s1254_s30, %s1254_s30 }
  0x2f   :  { %p1261_p8 = por %p1260_p7, %p1259_p6 }
  0x31   :  { %p1262_p9 = pnand %p1261_p8, %p1255_p5 }
  0x33   :  { %1265 = shalt.err (!%p1262_p9)
}
  0x34   :  { %100 = dma.hbm_to_vmem [thread:$0]  %s1670_s9, 2048, %s95_s25, [#allocation12], %s1387_s18, %s1387_s18, %s1388_s19  }
  0x35   :  { %s1391_s14 = smov [#allocation2]   ;;  %s1392_s16 = smov [#allocation7]  }
  0x36   :  { %s29_s15 = sshll.u32 %s1391_s14, 4  ;;  %s52_s1 = sshll.u32 %s1392_s16, 4  ;;  %s30_s15 = int_to_ptr.vmem [resolvable:$true] %s29_s15  ;;  %s53_s1 = int_to_ptr.vmem [resolvable:$true] %s52_s1 }
  0x37   :  { %s1266_s20 = scalar_lea.hbm %s1661_s0, 128 }
  0x38   :  { %p1267_p10 = scmp.ne.s32.totalorder %s1661_s0, %s1266_s20  ;;  %p1270_p11 = scmp.lt.u32.totalorder %s1266_s20, %s1661_s0 }
  0x3a   :  { %p1272_p12 = pnand %p1270_p11, %p1267_p10 }
  0x3c   :  { %1275 = shalt.err (!%p1272_p12)
}
  0x3d   :  { %s1276_s9 = scalar_lea.vmem %s30_s15, 128  ;;  %p1281_p0 = scmp.lt.s32.totalorder %s30_s15, %s30_s15 }
  0x3e   :  { %p1277_p13 = scmp.ne.s32.totalorder %s30_s15, %s1276_s9  ;;  %p1282_p1 = scmp.lt.s32.totalorder %s1276_s9, %s1276_s9 }
  0x40   :  { %p1283_p2 = por %p1282_p1, %p1281_p0 }
  0x42   :  { %p1284_p3 = pnand %p1283_p2, %p1277_p13 }
  0x44   :  { %1287 = shalt.err (!%p1284_p3)
}
  0x45   :  { %32 = dma.hbm_to_vmem [thread:$0]  %s1661_s0, 128, %s30_s15, [#allocation3]  }
  0x46   :  { %s1288_s5 = scalar_lea.hbm %s1664_s3, 2048 }
  0x47   :  { %p1289_p4 = scmp.ne.s32.totalorder %s1664_s3, %s1288_s5  ;;  %p1292_p5 = scmp.lt.u32.totalorder %s1288_s5, %s1664_s3 }
  0x49   :  { %p1294_p6 = pnand %p1292_p5, %p1289_p4 }
  0x4b   :  { %1297 = shalt.err (!%p1294_p6)
}
  0x4c   :  { %s1298_s17 = scalar_lea.vmem %s53_s1, 2048  ;;  %p1303_p8 = scmp.lt.s32.totalorder %s53_s1, %s53_s1 }
  0x4d   :  { %p1299_p7 = scmp.ne.s32.totalorder %s53_s1, %s1298_s17  ;;  %p1304_p9 = scmp.lt.s32.totalorder %s1298_s17, %s1298_s17 }
  0x4f   :  { %p1305_p10 = por %p1304_p9, %p1303_p8 }
  0x51   :  { %p1306_p11 = pnand %p1305_p10, %p1299_p7 }
  0x53   :  { %1309 = shalt.err (!%p1306_p11)
}
  0x54   :  { %58 = dma.hbm_to_vmem [thread:$0]  %s1664_s3, 2048, %s53_s1, [#allocation6], %s1387_s18, %s1387_s18, %s1388_s19  }
  0x55   :  { %s1393_s20 = smov [#allocation10]   ;;  %s1394_s22 = smov [#allocation13]  }
  0x56   :  { %s80_s21 = sshll.u32 %s1393_s20, 4  ;;  %s108_s24 = sshll.u32 %s1394_s22, 4  ;;  %s81_s21 = int_to_ptr.vmem [resolvable:$true] %s80_s21  ;;  %s109_s24 = int_to_ptr.vmem [resolvable:$true] %s108_s24 }
  0x57   :  { %s1310_s25 = scalar_lea.hbm %s1668_s7, 2048 }
  0x58   :  { %p1311_p12 = scmp.ne.s32.totalorder %s1668_s7, %s1310_s25  ;;  %p1314_p13 = scmp.lt.u32.totalorder %s1310_s25, %s1668_s7 }
  0x5a   :  { %p1316_p0 = pnand %p1314_p13, %p1311_p12 }
  0x5c   :  { %1319 = shalt.err (!%p1316_p0)
}
  0x5d   :  { %s1320_s3 = scalar_lea.vmem %s81_s21, 2048  ;;  %p1325_p2 = scmp.lt.s32.totalorder %s81_s21, %s81_s21 }
  0x5e   :  { %p1321_p1 = scmp.ne.s32.totalorder %s81_s21, %s1320_s3  ;;  %p1326_p3 = scmp.lt.s32.totalorder %s1320_s3, %s1320_s3 }
  0x60   :  { %p1327_p4 = por %p1326_p3, %p1325_p2 }
  0x62   :  { %p1328_p5 = pnand %p1327_p4, %p1321_p1 }
  0x64   :  { %1331 = shalt.err (!%p1328_p5)
}
  0x65   :  { %86 = dma.hbm_to_vmem [thread:$0]  %s1668_s7, 2048, %s81_s21, [#allocation9], %s1387_s18, %s1387_s18, %s1388_s19  }
  0x66   :  { %s1332_s26 = scalar_lea.hbm %s1672_s11, 2048 }
  0x67   :  { %p1333_p6 = scmp.ne.s32.totalorder %s1672_s11, %s1332_s26  ;;  %p1336_p7 = scmp.lt.u32.totalorder %s1332_s26, %s1672_s11 }
  0x69   :  { %p1338_p8 = pnand %p1336_p7, %p1333_p6 }
  0x6b   :  { %1341 = shalt.err (!%p1338_p8)
}
  0x6c   :  { %s1342_s22 = scalar_lea.vmem %s109_s24, 2048  ;;  %p1347_p10 = scmp.lt.s32.totalorder %s109_s24, %s109_s24 }
  0x6d   :  { %p1343_p9 = scmp.ne.s32.totalorder %s109_s24, %s1342_s22  ;;  %p1348_p11 = scmp.lt.s32.totalorder %s1342_s22, %s1342_s22 }
  0x6f   :  { %p1349_p12 = por %p1348_p11, %p1347_p10 }
  0x71   :  { %p1350_p13 = pnand %p1349_p12, %p1343_p9 }
  0x73   :  { %1353 = shalt.err (!%p1350_p13)
}
  0x74   :  { %114 = dma.hbm_to_vmem [thread:$0]  %s1672_s11, 2048, %s109_s24, [#allocation12], %s1387_s18, %s1387_s18, %s1388_s19  }
  0x75   :  { %1376 = dma.done.wait [#allocation3], 128  }
  0x76   :  { %1377 = vsyncadd [#allocation3], 4294967168 }
  0x77   :  { %1378 = dma.done.wait [#allocation6], 4096  }
  0x78   :  { %1379 = vsyncadd [#allocation6], 4294963200 }
  0x79   :  { %1380 = dma.done.wait [#allocation9], 4096  }
  0x7a   :  { %1381 = vsyncadd [#allocation9], 4294963200 }
  0x7b   :  { %1382 = dma.done.wait [#allocation12], 4096  }
  0x7c   :  { %1383 = vsyncadd [#allocation12], 4294963200  ;;  %v1395_v0 = vmov 0.0|0.0   ;;  %vm1396_vm0 = vmmov 0   ;;  %v1397_v1 = vmov 0.0   ;;  %v139_v2 = vld [vmem:[#allocation5] sm:$0xff] }
  0x7d   :  { %1043 = vmatprep.subr.bf16.mxu0 %v1395_v0  ;;  %865 = vmatprep.mubr.msk.f32.mxu0 %vm1396_vm0, %v1397_v1  ;;  %v140_v3 = vld [vmem:[#allocation5 + $0x8] sm:$0xff]  ;;  %v141_v4 = vld [vmem:[#allocation5 + $0x10] sm:$0xff]  ;;  %v142_v6 = vld [vmem:[#allocation5 + $0x18] sm:$0xff] }
  0x7e   :  { %1067 = vmatprep.subr.bf16.mxu1 %v1395_v0  ;;  %900 = vmatprep.mubr.msk.f32.mxu1 %vm1396_vm0, %v1397_v1  ;;  %v1044_v5 = vpack.c.bf16 %v140_v3, %v139_v2  ;;  %v1047_v7 = vpack.c.bf16 %v142_v6, %v141_v4  ;;  %v143_v8 = vld [vmem:[#allocation5 + $0x20] sm:$0xff]  ;;  %v144_v9 = vld [vmem:[#allocation5 + $0x28] sm:$0xff]  ;;  %v235_v12 = vld [vmem:[#allocation7 + $0x10] sm:$0xff] }
  0x7f   :  { %v233_v10 = vld [vmem:[#allocation7] sm:$0xff]  ;;  %v234_v11 = vld [vmem:[#allocation7 + $0x8] sm:$0xff]  ;;  %v236_v13 = vld [vmem:[#allocation7 + $0x18] sm:$0xff]  ;;  %v1050_v14 = vpack.c.bf16 %v144_v9, %v143_v8 }
  0x80   :  { %1045 = vmatpush3.bf16.msra.mxu0 %v1044_v5  ;;  %v1068_v15 = vpack.c.bf16 %v234_v11, %v233_v10  ;;  %v145_v16 = vld [vmem:[#allocation5 + $0x30] sm:$0xff]  ;;  %v146_v17 = vld [vmem:[#allocation5 + $0x38] sm:$0xff]  ;;  %v1071_v18 = vpack.c.bf16 %v236_v13, %v235_v12  ;;  %v237_v19 = vld [vmem:[#allocation7 + $0x20] sm:$0xff] }
  0x81   :  { %1046 = vmatprep.subr.bf16.mxu0 %v1395_v0  ;;  %v238_v20 = vld [vmem:[#allocation7 + $0x28] sm:$0xff]  ;;  %v1053_v21 = vpack.c.bf16 %v146_v17, %v145_v16  ;;  %v147_v22 = vld [vmem:[#allocation5 + $0x40] sm:$0xff]  ;;  %v239_v25 = vld [vmem:[#allocation7 + $0x30] sm:$0xff] }
  0x82   :  { %1069 = vmatpush3.bf16.msra.mxu1 %v1068_v15  ;;  %v148_v23 = vld [vmem:[#allocation5 + $0x48] sm:$0xff]  ;;  %v1074_v24 = vpack.c.bf16 %v238_v20, %v237_v19  ;;  %v240_v26 = vld [vmem:[#allocation7 + $0x38] sm:$0xff]  ;;  %v149_v28 = vld [vmem:[#allocation5 + $0x50] sm:$0xff] }
  0x83   :  { %1070 = vmatprep.subr.bf16.mxu1 %v1395_v0  ;;  %v1056_v27 = vpack.c.bf16 %v148_v23, %v147_v22  ;;  %v150_v29 = vld [vmem:[#allocation5 + $0x58] sm:$0xff]  ;;  %v1077_v30 = vpack.c.bf16 %v240_v26, %v239_v25  ;;  %v241_v31 = vld [vmem:[#allocation7 + $0x40] sm:$0xff]  ;;  %v242_v32 = vld [vmem:[#allocation7 + $0x48] sm:$0xff] }
  0x84   :  { %1048 = vmatpush3.bf16.msra.mxu0 %v1047_v7  ;;  %v1059_v33 = vpack.c.bf16 %v150_v29, %v149_v28  ;;  %v151_v34 = vld [vmem:[#allocation5 + $0x60] sm:$0xff]  ;;  %v152_v35 = vld [vmem:[#allocation5 + $0x68] sm:$0xff]  ;;  %v1080_v36 = vpack.c.bf16 %v242_v32, %v241_v31  ;;  %v243_v37 = vld [vmem:[#allocation7 + $0x50] sm:$0xff] }
  0x85   :  { %1049 = vmatprep.subr.bf16.mxu0 %v1395_v0  ;;  %v244_v38 = vld [vmem:[#allocation7 + $0x58] sm:$0xff]  ;;  %v1062_v39 = vpack.c.bf16 %v152_v35, %v151_v34  ;;  %v153_v40 = vld [vmem:[#allocation5 + $0x70] sm:$0xff]  ;;  %v245_v43 = vld [vmem:[#allocation7 + $0x60] sm:$0xff] }
  0x86   :  { %1072 = vmatpush3.bf16.msra.mxu1 %v1071_v18  ;;  %v154_v41 = vld [vmem:[#allocation5 + $0x78] sm:$0xff]  ;;  %v1083_v42 = vpack.c.bf16 %v244_v38, %v243_v37  ;;  %v246_v44 = vld [vmem:[#allocation7 + $0x68] sm:$0xff]  ;;  %v247_v48 = vld [vmem:[#allocation7 + $0x70] sm:$0xff] }
  0x87   :  { %1073 = vmatprep.subr.bf16.mxu1 %v1395_v0  ;;  %v1065_v45 = vpack.c.bf16 %v154_v41, %v153_v40  ;;  %v1086_v46 = vpack.c.bf16 %v246_v44, %v245_v43  ;;  %v138_v47 = vld [vmem:[#allocation2] sm:$0xff]  ;;  %v327_v51 = vld [vmem:[#allocation8] sm:$0xff]  ;;  %v328_v52 = vld [vmem:[#allocation8 + $0x8] sm:$0xff] }
  0x88   :  { %1051 = vmatpush3.bf16.msra.mxu0 %v1050_v14  ;;  %v248_v49 = vld [vmem:[#allocation7 + $0x78] sm:$0xff]  ;;  %v329_v53 = vld [vmem:[#allocation8 + $0x10] sm:$0xff]  ;;  %v1092_v54 = vpack.c.bf16 %v328_v52, %v327_v51  ;;  %v331_v57 = vld [vmem:[#allocation8 + $0x20] sm:$0xff] }
  0x89   :  { %1052 = vmatprep.subr.bf16.mxu0 %v1395_v0  ;;  %v1089_v50 = vpack.c.bf16 %v248_v49, %v247_v48  ;;  %v330_v55 = vld [vmem:[#allocation8 + $0x18] sm:$0xff]  ;;  %v332_v58 = vld [vmem:[#allocation8 + $0x28] sm:$0xff]  ;;  %v333_v60 = vld [vmem:[#allocation8 + $0x30] sm:$0xff] }
  0x8a   :  { %1075 = vmatpush3.bf16.msra.mxu1 %v1074_v24  ;;  %v1095_v56 = vpack.c.bf16 %v330_v55, %v329_v53  ;;  %v1098_v59 = vpack.c.bf16 %v332_v58, %v331_v57  ;;  %v334_v61 = vld [vmem:[#allocation8 + $0x38] sm:$0xff]  ;;  %v335_v63 = vld [vmem:[#allocation8 + $0x40] sm:$0xff]  ;;  %v336_v2 = vld [vmem:[#allocation8 + $0x48] sm:$0xff] }
  0x8b   :  { %1076 = vmatprep.subr.bf16.mxu1 %v1395_v0  ;;  %v1101_v62 = vpack.c.bf16 %v334_v61, %v333_v60  ;;  %v1104_v3 = vpack.c.bf16 %v336_v2, %v335_v63  ;;  %v337_v4 = vld [vmem:[#allocation8 + $0x50] sm:$0xff]  ;;  %v338_v5 = vld [vmem:[#allocation8 + $0x58] sm:$0xff]  ;;  %v339_v7 = vld [vmem:[#allocation8 + $0x60] sm:$0xff] }
  0x8c   :  { %1054 = vmatpush3.bf16.msra.mxu0 %v1053_v21  ;;  %v1107_v6 = vpack.c.bf16 %v338_v5, %v337_v4  ;;  %v340_v8 = vld [vmem:[#allocation8 + $0x68] sm:$0xff]  ;;  %v725_v10 = vld [vmem:[%s1663_s2] ss:$0 sm:$0xff]  ;;  %v341_v15 = vld [vmem:[#allocation8 + $0x70] sm:$0xff] }
  0x8d   :  { %1055 = vmatprep.subr.bf16.mxu0 %v1395_v0  ;;  %v1110_v9 = vpack.c.bf16 %v340_v8, %v339_v7  ;;  %v342_v16 = vld [vmem:[#allocation8 + $0x78] sm:$0xff]  ;;  %v421_v18 = vld [vmem:[#allocation10] sm:$0xff]  ;;  %v422_v19 = vld [vmem:[#allocation10 + $0x8] sm:$0xff] }
  0x8e   :  { %1078 = vmatpush3.bf16.msra.mxu1 %v1077_v30  ;;  %v1113_v17 = vpack.c.bf16 %v342_v16, %v341_v15  ;;  %v423_v20 = vld [vmem:[#allocation10 + $0x10] sm:$0xff]  ;;  %v1116_v21 = vpack.c.bf16 %v422_v19, %v421_v18  ;;  %v424_v22 = vld [vmem:[#allocation10 + $0x18] sm:$0xff]  ;;  %v425_v24 = vld [vmem:[#allocation10 + $0x20] sm:$0xff] }
  0x8f   :  { %1079 = vmatprep.subr.bf16.mxu1 %v1395_v0  ;;  %v1119_v23 = vpack.c.bf16 %v424_v22, %v423_v20  ;;  %v426_v25 = vld [vmem:[#allocation10 + $0x28] sm:$0xff]  ;;  %v428_v28 = vld [vmem:[#allocation10 + $0x38] sm:$0xff]  ;;  %v429_v30 = vld [vmem:[#allocation10 + $0x40] sm:$0xff] }
  0x90   :  { %1057 = vmatpush3.bf16.msra.mxu0 %v1056_v27  ;;  %v1122_v26 = vpack.c.bf16 %v426_v25, %v425_v24  ;;  %v427_v27 = vld [vmem:[#allocation10 + $0x30] sm:$0xff]  ;;  %v430_v31 = vld [vmem:[#allocation10 + $0x48] sm:$0xff]  ;;  %v432_v34 = vld [vmem:[#allocation10 + $0x58] sm:$0xff] }
  0x91   :  { %1058 = vmatprep.subr.bf16.mxu0 %v1395_v0  ;;  %v1125_v29 = vpack.c.bf16 %v428_v28, %v427_v27  ;;  %v1128_v32 = vpack.c.bf16 %v430_v31, %v429_v30  ;;  %v434_v37 = vld [vmem:[#allocation10 + $0x68] sm:$0xff]  ;;  %v514_v40 = vld [vmem:[#allocation11] sm:$0xff]  ;;  %v517_v48 = vld [vmem:[#allocation11 + $0x18] sm:$0xff] }
  0x92   :  { %1081 = vmatpush3.bf16.msra.mxu1 %v1080_v36  ;;  %v433_v36 = vld [vmem:[#allocation10 + $0x60] sm:$0xff]  ;;  %v515_v41 = vld [vmem:[#allocation11 + $0x8] sm:$0xff]  ;;  %v520_v53 = vld [vmem:[#allocation11 + $0x30] sm:$0xff] }
  0x93   :  { %1082 = vmatprep.subr.bf16.mxu1 %v1395_v0  ;;  %v1134_v38 = vpack.c.bf16 %v434_v37, %v433_v36  ;;  %v519_v51 = vld [vmem:[#allocation11 + $0x28] sm:$0xff]  ;;  %v525_v60 = vld [vmem:[#allocation11 + $0x58] sm:$0xff]  ;;  %v612_v20 = vld [vmem:[#allocation13 + $0x20] sm:$0xff] }
  0x94   :  { %1060 = vmatpush3.bf16.msra.mxu0 %v1059_v33  ;;  %v431_v33 = vld [vmem:[#allocation10 + $0x50] sm:$0xff]  ;;  %v523_v57 = vld [vmem:[#allocation11 + $0x48] sm:$0xff]  ;;  %v529_v4 = vld [vmem:[#allocation11 + $0x78] sm:$0xff] }
  0x95   :  { %1061 = vmatprep.subr.bf16.mxu0 %v1395_v0  ;;  %v1131_v35 = vpack.c.bf16 %v432_v34, %v431_v33  ;;  %v527_v63 = vld [vmem:[#allocation11 + $0x68] sm:$0xff]  ;;  %v436_v7 = vld [vmem:[#allocation10 + $0x78] sm:$0xff]  ;;  %v620_v31 = vld [vmem:[#allocation13 + $0x60] sm:$0xff] }
  0x96   :  { %1084 = vmatpush3.bf16.msra.mxu1 %v1083_v42  ;;  %v611_v18 = vld [vmem:[#allocation13 + $0x18] sm:$0xff]  ;;  %v617_v27 = vld [vmem:[#allocation13 + $0x48] sm:$0xff]  ;;  %v622_v34 = vld [vmem:[#allocation13 + $0x70] sm:$0xff] }
  0x97   :  { %1085 = vmatprep.subr.bf16.mxu1 %v1395_v0  ;;  %v615_v24 = vld [vmem:[#allocation13 + $0x38] sm:$0xff] }
  0x98   :  { %1063 = vmatpush3.bf16.msra.mxu0 %v1062_v39  ;;  %v726_v39 = vld [vmem:[%s1665_s4] ss:$0 sm:$0xff] }
  0x99   :  { %1064 = vmatprep.subr.bf16.mxu0 %v1395_v0  ;;  %v729_v36 = vld [vmem:[%s1671_s10] ss:$0 sm:$0xff]  ;;  %s1398_s10 = smov [#allocation14]  }
  0x9a   :  { %1087 = vmatpush3.bf16.msra.mxu1 %v1086_v46  ;;  %s713_s30 = sshll.u32 %s1398_s10, 4  ;;  %s714_s30 = int_to_ptr.vmem [resolvable:$true] %s713_s30 }
  0x9b   :  { %1088 = vmatprep.subr.bf16.mxu1 %v1395_v0  ;;  %p1359_p1 = scmp.lt.s32.totalorder %s714_s30, %s714_s30 }
  0x9c   :  { %1066 = vmatpush3.bf16.msra.mxu0 %v1065_v45  ;;  %v1140_v45 = vpack.c.bf16 %v515_v41, %v514_v40 }
  0x9d   :  { %1091 = vmatprep.subr.bf16.mxu0 %v1395_v0 }
  0x9e   :  { %1090 = vmatpush3.bf16.msra.mxu1 %v1089_v50  ;;  %v518_v50 = vld [vmem:[#allocation11 + $0x20] sm:$0xff] }
  0x9f   :  { %866 = vmatmul.mubr.f32.vlgmr.msra.gmra.mrb[0].mxu0 %v138_v47  ;;  %1115 = vmatprep.subr.bf16.mxu1 %v1395_v0  ;;  %v516_v47 = vld [vmem:[#allocation11 + $0x10] sm:$0xff]  ;;  %v1146_v52 = vpack.c.bf16 %v519_v51, %v518_v50 }
  0xa0   :  { %935 = vmatprep.mubr.msk.f32.mxu0 %vm1396_vm0, %v1397_v1  ;;  %1093 = vmatpush3.bf16.msra.mxu0 %v1092_v54  ;;  %v1143_v49 = vpack.c.bf16 %v517_v48, %v516_v47  ;;  %v521_v54 = vld [vmem:[#allocation11 + $0x38] sm:$0xff] }
  0xa1   :  { %1094 = vmatprep.subr.bf16.mxu0 %v1395_v0  ;;  %v1149_v55 = vpack.c.bf16 %v521_v54, %v520_v53 }
  0xa4   :  { %1096 = vmatpush3.bf16.msra.mxu0 %v1095_v56  ;;  %v522_v56 = vld [vmem:[#allocation11 + $0x40] sm:$0xff] }
  0xa5   :  { %1097 = vmatprep.subr.bf16.mxu0 %v1395_v0  ;;  %v1152_v58 = vpack.c.bf16 %v523_v57, %v522_v56 }
  0xa8   :  { %1099 = vmatpush3.bf16.msra.mxu0 %v1098_v59  ;;  %v524_v59 = vld [vmem:[#allocation11 + $0x50] sm:$0xff] }
  0xa9   :  { %1100 = vmatprep.subr.bf16.mxu0 %v1395_v0  ;;  %v1155_v61 = vpack.c.bf16 %v525_v60, %v524_v59 }
  0xac   :  { %1102 = vmatpush3.bf16.msra.mxu0 %v1101_v62  ;;  %v526_v62 = vld [vmem:[#allocation11 + $0x60] sm:$0xff] }
  0xad   :  { %1103 = vmatprep.subr.bf16.mxu0 %v1395_v0  ;;  %v1158_v2 = vpack.c.bf16 %v527_v63, %v526_v62 }
  0xb0   :  { %1105 = vmatpush3.bf16.msra.mxu0 %v1104_v3  ;;  %v528_v3 = vld [vmem:[#allocation11 + $0x70] sm:$0xff] }
  0xb1   :  { %1106 = vmatprep.subr.bf16.mxu0 %v1395_v0  ;;  %v1161_v5 = vpack.c.bf16 %v529_v4, %v528_v3 }
  0xb4   :  { %1108 = vmatpush3.bf16.msra.mxu0 %v1107_v6  ;;  %v435_v6 = vld [vmem:[#allocation10 + $0x70] sm:$0xff] }
  0xb5   :  { %1109 = vmatprep.subr.bf16.mxu0 %v1395_v0  ;;  %v1137_v8 = vpack.c.bf16 %v436_v7, %v435_v6 }
  0xb8   :  { %1111 = vmatpush3.bf16.msra.mxu0 %v1110_v9  ;;  %v727_v9 = vld [vmem:[%s1667_s6] ss:$0 sm:$0xff] }
  0xb9   :  { %1112 = vmatprep.subr.bf16.mxu0 %v1395_v0 }
  0xbc   :  { %1114 = vmatpush3.bf16.msra.mxu0 %v1113_v17  ;;  %v610_v17 = vld [vmem:[#allocation13 + $0x10] sm:$0xff] }
  0xbd   :  { %1139 = vmatprep.subr.bf16.mxu0 %v1395_v0  ;;  %v1167_v19 = vpack.c.bf16 %v611_v18, %v610_v17 }
 0x172   :  { %v228_v11 = vpop.f32.mrb[0].mxu0 }
 0x173   :  { %v229_v12 = vadd.f32 %v725_v10, %v228_v11  ;;  %v867_v13 = vpop.f32.mrb[1].mxu0  ;;  %v608_v10 = vld [vmem:[#allocation13] sm:$0xff]  ;;  %v609_v11 = vld [vmem:[#allocation13 + $0x8] sm:$0xff] }
 0x174   :  { %v1164_v15 = vpack.c.bf16 %v609_v11, %v608_v10 }
 0x175   :  { %v232_v14 = vmax.f32 %v229_v12, 0.0 }
 0x177   :  { %901 = vmatmul.mubr.f32.vlgmr.msra.gmra.mrb[0].mxu1 %v232_v14 }
 0x178   :  { %970 = vmatprep.mubr.msk.f32.mxu1 %vm1396_vm0, %v1397_v1  ;;  %1117 = vmatpush3.bf16.msra.mxu1 %v1116_v21  ;;  %v613_v21 = vld [vmem:[#allocation13 + $0x28] sm:$0xff] }
 0x179   :  { %1118 = vmatprep.subr.bf16.mxu1 %v1395_v0  ;;  %v1170_v22 = vpack.c.bf16 %v613_v21, %v612_v20 }
 0x17c   :  { %1120 = vmatpush3.bf16.msra.mxu1 %v1119_v23  ;;  %v614_v23 = vld [vmem:[#allocation13 + $0x30] sm:$0xff] }
 0x17d   :  { %1121 = vmatprep.subr.bf16.mxu1 %v1395_v0  ;;  %v1173_v25 = vpack.c.bf16 %v615_v24, %v614_v23 }
 0x180   :  { %1123 = vmatpush3.bf16.msra.mxu1 %v1122_v26  ;;  %v616_v26 = vld [vmem:[#allocation13 + $0x40] sm:$0xff] }
 0x181   :  { %1124 = vmatprep.subr.bf16.mxu1 %v1395_v0  ;;  %v1176_v28 = vpack.c.bf16 %v617_v27, %v616_v26 }
 0x184   :  { %1126 = vmatpush3.bf16.msra.mxu1 %v1125_v29  ;;  %v619_v29 = vld [vmem:[#allocation13 + $0x58] sm:$0xff] }
 0x185   :  { %1127 = vmatprep.subr.bf16.mxu1 %v1395_v0 }
 0x188   :  { %1129 = vmatpush3.bf16.msra.mxu1 %v1128_v32  ;;  %v621_v32 = vld [vmem:[#allocation13 + $0x68] sm:$0xff] }
 0x189   :  { %1130 = vmatprep.subr.bf16.mxu1 %v1395_v0  ;;  %v1182_v33 = vpack.c.bf16 %v621_v32, %v620_v31 }
 0x18c   :  { %1132 = vmatpush3.bf16.msra.mxu1 %v1131_v35  ;;  %v623_v35 = vld [vmem:[#allocation13 + $0x78] sm:$0xff] }
 0x18d   :  { %1133 = vmatprep.subr.bf16.mxu1 %v1395_v0  ;;  %v1185_v37 = vpack.c.bf16 %v623_v35, %v622_v34 }
 0x190   :  { %1135 = vmatpush3.bf16.msra.mxu1 %v1134_v38 }
 0x191   :  { %1136 = vmatprep.subr.bf16.mxu1 %v1395_v0 }
 0x194   :  { %1138 = vmatpush3.bf16.msra.mxu1 %v1137_v8 }
 0x195   :  { %1163 = vmatprep.subr.bf16.mxu1 %v1395_v0 }
 0x24a   :  { %v322_v42 = vpop.f32.mrb[0].mxu1 }
 0x24b   :  { %v323_v43 = vadd.f32 %v726_v39, %v322_v42  ;;  %v902_v44 = vpop.f32.mrb[1].mxu1  ;;  %v728_v42 = vld [vmem:[%s1669_s8] ss:$0 sm:$0xff]  ;;  %s1354_s8 = scalar_lea.vmem %s714_s30, 128 }
 0x24c   :  { %p1355_p0 = scmp.ne.s32.totalorder %s714_s30, %s1354_s8  ;;  %p1360_p2 = scmp.lt.s32.totalorder %s1354_s8, %s1354_s8 }
 0x24d   :  { %v326_v46 = vmax.f32 %v323_v43, 0.0 }
 0x24e   :  { %p1361_p3 = por %p1360_p2, %p1359_p1 }
 0x24f   :  { %936 = vmatmul.mubr.f32.vlgmr.msra.gmra.mrb[2].mxu0 %v326_v46 }
 0x250   :  { %1141 = vmatpush3.bf16.msra.mxu0 %v1140_v45  ;;  %1005 = vmatprep.mubr.msk.f32.mxu0 %vm1396_vm0, %v1397_v1  ;;  %p1362_p4 = pnand %p1361_p3, %p1355_p0 }
 0x251   :  { %1142 = vmatprep.subr.bf16.mxu0 %v1395_v0 }
 0x254   :  { %1144 = vmatpush3.bf16.msra.mxu0 %v1143_v49 }
 0x255   :  { %1145 = vmatprep.subr.bf16.mxu0 %v1395_v0 }
 0x258   :  { %1147 = vmatpush3.bf16.msra.mxu0 %v1146_v52 }
 0x259   :  { %1148 = vmatprep.subr.bf16.mxu0 %v1395_v0 }
 0x25c   :  { %1150 = vmatpush3.bf16.msra.mxu0 %v1149_v55 }
 0x25d   :  { %1151 = vmatprep.subr.bf16.mxu0 %v1395_v0 }
 0x260   :  { %1153 = vmatpush3.bf16.msra.mxu0 %v1152_v58 }
 0x261   :  { %1154 = vmatprep.subr.bf16.mxu0 %v1395_v0 }
 0x264   :  { %1156 = vmatpush3.bf16.msra.mxu0 %v1155_v61 }
 0x265   :  { %1157 = vmatprep.subr.bf16.mxu0 %v1395_v0 }
 0x268   :  { %1159 = vmatpush3.bf16.msra.mxu0 %v1158_v2 }
 0x269   :  { %1160 = vmatprep.subr.bf16.mxu0 %v1395_v0 }
 0x26c   :  { %1162 = vmatpush3.bf16.msra.mxu0 %v1161_v5 }
 0x26f   :  { %1006 = vmatmul.mubr.f32.vlgmr.msra.gmra.mrb[4].mxu0 %v326_v46  ;;  %v730_v46 = vld [vmem:[%s1673_s12] ss:$0 sm:$0xff] }
 0x322   :  { %v416_v12 = vpop.f32.mrb[2].mxu0 }
 0x323   :  { %v417_v13 = vadd.f32 %v727_v9, %v416_v12  ;;  %v937_v14 = vpop.f32.mrb[3].mxu0 }
 0x325   :  { %v420_v16 = vmax.f32 %v417_v13, 0.0 }
 0x327   :  { %971 = vmatmul.mubr.f32.vlgmr.msra.gmra.mrb[2].mxu1 %v420_v16 }
 0x328   :  { %1165 = vmatpush3.bf16.msra.mxu1 %v1164_v15  ;;  %1040 = vmatprep.mubr.msk.f32.mxu1 %vm1396_vm0, %v1397_v1  ;;  %v618_v1 = vld [vmem:[#allocation13 + $0x50] sm:$0xff] }
 0x329   :  { %1166 = vmatprep.subr.bf16.mxu1 %v1395_v0  ;;  %v1179_v30 = vpack.c.bf16 %v619_v29, %v618_v1 }
 0x32c   :  { %1168 = vmatpush3.bf16.msra.mxu1 %v1167_v19 }
 0x32d   :  { %1169 = vmatprep.subr.bf16.mxu1 %v1395_v0 }
 0x330   :  { %1171 = vmatpush3.bf16.msra.mxu1 %v1170_v22 }
 0x331   :  { %1172 = vmatprep.subr.bf16.mxu1 %v1395_v0 }
 0x334   :  { %1174 = vmatpush3.bf16.msra.mxu1 %v1173_v25 }
 0x335   :  { %1175 = vmatprep.subr.bf16.mxu1 %v1395_v0 }
 0x338   :  { %1177 = vmatpush3.bf16.msra.mxu1 %v1176_v28 }
 0x339   :  { %1178 = vmatprep.subr.bf16.mxu1 %v1395_v0 }
 0x33c   :  { %1180 = vmatpush3.bf16.msra.mxu1 %v1179_v30 }
 0x33d   :  { %1181 = vmatprep.subr.bf16.mxu1 %v1395_v0 }
 0x340   :  { %1183 = vmatpush3.bf16.msra.mxu1 %v1182_v33 }
 0x341   :  { %1184 = vmatprep.subr.bf16.mxu1 %v1395_v0 }
 0x342   :  { %v603_v38 = vpop.f32.mrb[4].mxu0 }
 0x343   :  { %v604_v39 = vadd.f32 %v729_v36, %v603_v38  ;;  %v1007_v40 = vpop.f32.mrb[5].mxu0 }
 0x344   :  { %1186 = vmatpush3.bf16.msra.mxu1 %v1185_v37 }
 0x345   :  { %v607_v41 = vmax.f32 %v604_v39, 0.0 }
 0x347   :  { %1041 = vmatmul.mubr.f32.vlgmr.msra.gmra.mrb[4].mxu1 %v607_v41 }
 0x3fa   :  { %v510_v43 = vpop.f32.mrb[2].mxu1 }
 0x3fb   :  { %v511_v44 = vadd.f32 %v728_v42, %v510_v43  ;;  %v972_v45 = vpop.f32.mrb[3].mxu1 }
 0x3fd   :  { %701 = vadd.xlane.f32.xlu0 %v511_v44 }
 0x41a   :  { %v697_v47 = vpop.f32.mrb[4].mxu1 }
 0x41b   :  { %v698_v0 = vadd.f32 %v730_v46, %v697_v47  ;;  %v1042_v48 = vpop.f32.mrb[5].mxu1 }
 0x41d   :  { %v704_v49 = vadd.f32 %v698_v0, %v511_v44 }
 0x48a   :  { %v702_v50 = vpop.xlane.xlu0 %701 }
 0x48b   :  { %v703_v51 = vmul.f32 0.25, %v702_v50 }
 0x48d   :  { %v705_v52 = vsub.f32 %v704_v49, %v703_v51 }
 0x48f   :  { %706 = vst [vmem:[#allocation14] sm:$0xff] %v705_v52 }
 0x490   :  { %1365 = shalt.err (!%p1362_p4)
}
 0x491   :  { %s1366_s3 = scalar_lea.hbm %s1674_s13, 128 }
 0x492   :  { %p1367_p5 = scmp.ne.s32.totalorder %s1674_s13, %s1366_s3  ;;  %p1370_p6 = scmp.lt.u32.totalorder %s1366_s3, %s1674_s13 }
 0x494   :  { %p1372_p7 = pnand %p1370_p6, %p1367_p5 }
 0x496   :  { %1375 = shalt.err (!%p1372_p7)
}
 0x497   :  { %716 = dma.vmem_to_hbm [thread:$0]  %s714_s30, 128, %s1674_s13, [#allocation4]  }
 0x498   :  { %1384 = dma.done.wait [#allocation4], 128  }
 0x499   :  { %1385 = vsyncadd [#allocation4], 4294967168 }
 0x49a   :  { %720 = vsyncpa [#allocation3], 1 }
 0x49b   :  { %721 = vsyncpa [#allocation6], 1 }
 0x49c   :  { %722 = vsyncpa [#allocation9], 1 }
 0x49d   :  { %723 = vsyncpa [#allocation12], 1 }
 0x49e   :  { %724 = vsyncpa [#allocation4], 1 }

</bundles_post_ra>
